<compile_context>
chip_gen: v7x
topology: tpu7x:2x2x1
jax: 0.10.0
libtpu: 0.0.40
codegen_flags: <defaults>
</compile_context>

<pallas_src>
import functools

import jax
import jax.numpy as jnp
from jax.experimental import pallas as pl
from jax.experimental.pallas import tpu as pltpu

HID1 = 256        # fc1 width
HID2 = 64         # fc2 / fc4 width
HCAT = 2 * HID2   # fused branch width (128 lanes)
N_OUT = 128       # lane-dense output slab width (advantage lanes + value lanes)


def _round_up(v, m):
    return ((v + m - 1) // m) * m


def dueling_dqn_kernel(n_valid, n_adv,
                       x_ref, w1_ref, b1_ref, w24_ref, b24_ref,
                       w35_ref, b35_ref, o_ref, psum_ref):
    tb = x_ref.shape[0]

    # x stays f32 in HBM (no wrapper pad/cast pass); cast to bf16 for the MXU.
    x = x_ref[...].astype(jnp.bfloat16)                            # (TB, D)

    # Shared trunk: t = relu(x @ W1 + b1).  Bias/relu epilogue stays f32; a
    # single bf16 materialization feeds the next GEMM (no f32 + bf16 copies).
    t = jnp.maximum(
        jnp.dot(x, w1_ref[...], preferred_element_type=jnp.float32) + b1_ref[...],
        0.0).astype(jnp.bfloat16)                                  # (TB, 256)

    # Fused branches: h = relu(t @ [w2 | w4] + [b2 | b4]).
    h = jnp.maximum(
        jnp.dot(t, w24_ref[...], preferred_element_type=jnp.float32) + b24_ref[...],
        0.0).astype(jnp.bfloat16)                                  # (TB, 128)

    # Fused heads: lanes [0, A) = value + advantage, lanes [A, 128) = value.
    o = jnp.dot(h, w35_ref[...], preferred_element_type=jnp.float32) + b35_ref[...]

    # bf16 lane-dense output slab (halves HBM store traffic vs f32).
    o_ref[...] = o.astype(jnp.bfloat16)

    # Per-tile f32 advantage column sums from the f32 accumulator (padded batch
    # rows masked).  Lanes >= A subtract to exactly zero (identical columns), so
    # the wrapper only sums and divides -- no second HBM reduce over the slab.
    adv_full = o - o[:, n_adv:n_adv + 1]                            # (TB, 128)
    row = pl.program_id(0) * tb + jax.lax.broadcasted_iota(jnp.int32, (tb, 1), 0)
    colsum = jnp.sum(jnp.where(row < n_valid, adv_full, 0.0),
                     axis=0, keepdims=True)                         # (1, 128) f32
    psum_ref[...] = jnp.broadcast_to(colsum[None], psum_ref.shape)  # (1, 8, 128)


def pack_params(params):
    """Pack the five Linear layers into fused / lane-padded kernel operands."""
    w1, b1, w2, b2, w3, b3, w4, b4, w5, b5 = params
    a = w3.shape[1]

    w24 = jnp.concatenate([w2, w4], axis=1)                        # (256, 128)
    b24 = jnp.concatenate([b2, b4], axis=1)                        # (1, 128)

    w35_top = jnp.pad(w3, ((0, 0), (0, N_OUT - a)))                # (64, 128)
    w35_bot = jnp.broadcast_to(w5, (HID2, N_OUT))                  # (64, 128)
    w35 = jnp.concatenate([w35_top, w35_bot], axis=0)              # (128, 128)
    b35 = jnp.concatenate([b3 + b5,
                           jnp.broadcast_to(b5, (1, N_OUT - a))], axis=1)

    return (w1.astype(jnp.bfloat16), b1,                           # W1 unpadded
            w24.astype(jnp.bfloat16), b24,
            w35.astype(jnp.bfloat16), b35)


def _pick_tile(b, d_in):
    """Batch tile: multiple of 16, <= 2048, VMEM-aware; even #tiles when large."""
    b16 = _round_up(max(b, 16), 16)
    # Rough per-row VMEM budget: x f32 double-buffer + bf16 slab double-buffer
    # + bf16/f32 intermediates for t/h/o.  Keep well under the 32 MiB limit.
    bytes_per_row = 8 * d_in + 6 * 1024
    tb_cap = max(16, min(2048, ((16 << 20) // bytes_per_row) // 16 * 16))
    if b16 <= tb_cap and b16 < 1024:
        tb = b16                                   # single small tile
    else:
        target = tb_cap
        n_tiles = max(2, -(-b16 // target))
        n_tiles += n_tiles % 2                     # even tile count (v7x: 2 TCs)
        tb = min(tb_cap, _round_up(-(-b16 // n_tiles), 16))
    b_pad = _round_up(b16, tb)
    return tb, b_pad, b_pad // tb


@jax.jit
def dueling_dqn_forward(x, params):
    a_out = params[4].shape[1]          # w3: (64, output_size)
    b, d_in = x.shape

    tb, b_pad, n_tiles = _pick_tile(b, d_in)

    # Only the batch dim is padded (feature dim is fed at its real width and
    # the bf16 cast happens inside the kernel).
    x_in = x if b_pad == b else jnp.pad(x, ((0, b_pad - b), (0, 0)))
    w1_p, b1, w24, b24, w35, b35 = pack_params(params)

    flops = 2 * b_pad * (d_in * HID1 + HID1 * HCAT + HCAT * N_OUT)
    bytes_accessed = (x_in.size * 4 + b_pad * N_OUT * 2 + n_tiles * 8 * N_OUT * 4
                      + (w1_p.size + w24.size + w35.size) * 2
                      + (b1.size + b24.size + b35.size) * 4)

    resident = lambda i: (0, 0)   # same block every step -> stays VMEM-resident
    kernel = functools.partial(dueling_dqn_kernel, b, a_out)

    slab, psums = pl.pallas_call(
        kernel,
        out_shape=(jax.ShapeDtypeStruct((b_pad, N_OUT), jnp.bfloat16),
                   jax.ShapeDtypeStruct((n_tiles, 8, N_OUT), jnp.float32)),
        grid_spec=pltpu.PrefetchScalarGridSpec(
            num_scalar_prefetch=0,
            grid=(n_tiles,),
            in_specs=[
                pl.BlockSpec((tb, d_in), lambda i: (i, 0)),    # x batch tile (f32)
                pl.BlockSpec((d_in, HID1), resident),          # W1
                pl.BlockSpec((1, HID1), resident),             # b1
                pl.BlockSpec((HID1, HCAT), resident),          # [w2 | w4]
                pl.BlockSpec((1, HCAT), resident),             # [b2 | b4]
                pl.BlockSpec((HCAT, N_OUT), resident),         # fused heads
                pl.BlockSpec((1, N_OUT), resident),            # fused head bias
            ],
            out_specs=[
                pl.BlockSpec((tb, N_OUT), lambda i: (i, 0)),       # bf16 slab
                pl.BlockSpec((1, 8, N_OUT), lambda i: (i, 0, 0)),  # f32 partials
            ],
        ),
        compiler_params=pltpu.CompilerParams(
            dimension_semantics=("parallel",),
            vmem_limit_bytes=32 * 1024 * 1024,
        ),
        cost_estimate=pl.CostEstimate(
            flops=flops, transcendentals=0, bytes_accessed=bytes_accessed),
    )(x_in, w1_p, b1, w24, b24, w35, b35)

    # Global advantage mean from f32 per-tile partial sums (each tile writes its
    # (1,128) column sums replicated across 8 sublanes -> divide by 8).
    adv_mean = psums.sum(dtype=jnp.float32) / (8.0 * b * a_out)

    combined = slab[:b, :a_out].astype(jnp.float32)   # value + advantage
    return combined - adv_mean


def init_params(key, input_size, output_size):
    """Deterministic synthetic parameters (shapes match the nn.Module)."""
    ks = jax.random.split(key, 10)

    def lin(kw, kb, fan_in, fan_out):
        bound = 1.0 / jnp.sqrt(jnp.float32(fan_in))
        w = jax.random.uniform(kw, (fan_in, fan_out), jnp.float32, -bound, bound)
        b = jax.random.uniform(kb, (1, fan_out), jnp.float32, -bound, bound)
        return w, b

    w1, b1 = lin(ks[0], ks[1], input_size, HID1)
    w2, b2 = lin(ks[2], ks[3], HID1, HID2)
    w3, b3 = lin(ks[4], ks[5], HID2, output_size)
    w4, b4 = lin(ks[6], ks[7], HID1, HID2)
    w5, b5 = lin(ks[8], ks[9], HID2, 1)
    return (w1, b1, w2, b2, w3, b3, w4, b4, w5, b5)


def reference_forward(x, params):
    (w1, b1, w2, b2, w3, b3, w4, b4, w5, b5) = params
    t = jax.nn.relu(x @ w1 + b1)
    adv = jax.nn.relu(t @ w2 + b2) @ w3 + b3
    val = jax.nn.relu(t @ w4 + b4) @ w5 + b5
    return val + adv - adv.mean()


if __name__ == "__main__":
    key = jax.random.PRNGKey(0)
    k_x, k_p = jax.random.split(key)

    batch, input_size, output_size = 2, 16, 8
    x = jax.random.normal(k_x, (batch, input_size), jnp.float32)
    params = init_params(k_p, input_size, output_size)

    out = jax.block_until_ready(dueling_dqn_forward(x, params))
    ref = reference_forward(x, params)

    assert out.shape == (batch, output_size)
    max_err = float(jnp.max(jnp.abs(out - ref)))
    # bf16 MXU operands + bf16 output slab (f32 accumulation / f32 mean partials)
    # -> small numeric drift vs the f32 reference.
    assert jnp.allclose(out, ref, atol=2.5e-2, rtol=2.5e-2), f"max abs err {max_err}"

    print("KERNEL_OK")
</pallas_src>

<mosaic_0001>
module attributes {stable_mosaic.version = 11 : i64} {
  func.func @dueling_dqn_kernel(%arg0: i32, %arg1: memref<16x16xf32, #tpu.memory_space<vmem>>, %arg2: memref<16x256xbf16, #tpu.memory_space<vmem>>, %arg3: memref<1x256xf32, #tpu.memory_space<vmem>>, %arg4: memref<256x128xbf16, #tpu.memory_space<vmem>>, %arg5: memref<1x128xf32, #tpu.memory_space<vmem>>, %arg6: memref<128x128xbf16, #tpu.memory_space<vmem>>, %arg7: memref<1x128xf32, #tpu.memory_space<vmem>>, %arg8: memref<16x128xbf16, #tpu.memory_space<vmem>>, %arg9: memref<1x8x128xf32, #tpu.memory_space<vmem>>) attributes {dimension_semantics = [#tpu.dimension_semantics<parallel>], iteration_bounds = array<i64: 1>, scalar_prefetch = 0 : i64, scratch_operands = 0 : i64, tpu.core_type = #tpu.core_type<tc>, window_params = [{transform_indices = @transform_0, window_bounds = array<i64: 16, 16>}, {pipeline_mode = #tpu.pipeline_mode<synchronous>, transform_indices = @transform_1, window_bounds = array<i64: 16, 256>}, {pipeline_mode = #tpu.pipeline_mode<synchronous>, transform_indices = @transform_2, window_bounds = array<i64: 1, 256>}, {pipeline_mode = #tpu.pipeline_mode<synchronous>, transform_indices = @transform_3, window_bounds = array<i64: 256, 128>}, {pipeline_mode = #tpu.pipeline_mode<synchronous>, transform_indices = @transform_4, window_bounds = array<i64: 1, 128>}, {pipeline_mode = #tpu.pipeline_mode<synchronous>, transform_indices = @transform_5, window_bounds = array<i64: 128, 128>}, {pipeline_mode = #tpu.pipeline_mode<synchronous>, transform_indices = @transform_6, window_bounds = array<i64: 1, 128>}, {transform_indices = @transform_7, window_bounds = array<i64: 16, 128>}, {transform_indices = @transform_8, window_bounds = array<i64: 1, 8, 128>}]} {
    %c0 = arith.constant 0 : index
    %c0_0 = arith.constant 0 : index
    %0 = vector.load %arg1[%c0, %c0_0] : memref<16x16xf32, #tpu.memory_space<vmem>>, vector<16x16xf32>
    %1 = arith.truncf %0 : vector<16x16xf32> to vector<16x16xbf16>
    %c0_1 = arith.constant 0 : index
    %c0_2 = arith.constant 0 : index
    %2 = vector.load %arg2[%c0_1, %c0_2] : memref<16x256xbf16, #tpu.memory_space<vmem>>, vector<16x256xbf16>
    %cst = arith.constant dense<0.000000e+00> : vector<16x256xf32>
    %3 = tpu.matmul %1, %2, %cst {dimension_numbers = #tpu.dot_dimension_numbers<[1], [0], [0], [1], [0, 0, 1, 1], [], []>} : vector<16x16xbf16>, vector<16x256xbf16>, vector<16x256xf32> -> vector<16x256xf32>
    %c0_3 = arith.constant 0 : index
    %c0_4 = arith.constant 0 : index
    %4 = vector.load %arg3[%c0_3, %c0_4] : memref<1x256xf32, #tpu.memory_space<vmem>>, vector<1x256xf32>
    %5 = vector.broadcast %4 : vector<1x256xf32> to vector<16x256xf32>
    %6 = arith.addf %3, %5 : vector<16x256xf32>
    %cst_5 = arith.constant 0.000000e+00 : f32
    %7 = vector.broadcast %cst_5 : f32 to vector<16x256xf32>
    %8 = arith.maximumf %6, %7 : vector<16x256xf32>
    %9 = arith.truncf %8 : vector<16x256xf32> to vector<16x256xbf16>
    %c0_6 = arith.constant 0 : index
    %c0_7 = arith.constant 0 : index
    %10 = vector.load %arg4[%c0_6, %c0_7] : memref<256x128xbf16, #tpu.memory_space<vmem>>, vector<256x128xbf16>
    %cst_8 = arith.constant dense<0.000000e+00> : vector<16x128xf32>
    %11 = tpu.matmul %9, %10, %cst_8 {dimension_numbers = #tpu.dot_dimension_numbers<[1], [0], [0], [1], [0, 0, 1, 1], [], []>} : vector<16x256xbf16>, vector<256x128xbf16>, vector<16x128xf32> -> vector<16x128xf32>
    %c0_9 = arith.constant 0 : index
    %c0_10 = arith.constant 0 : index
    %12 = vector.load %arg5[%c0_9, %c0_10] : memref<1x128xf32, #tpu.memory_space<vmem>>, vector<1x128xf32>
    %13 = vector.broadcast %12 : vector<1x128xf32> to vector<16x128xf32>
    %14 = arith.addf %11, %13 : vector<16x128xf32>
    %cst_11 = arith.constant 0.000000e+00 : f32
    %15 = vector.broadcast %cst_11 : f32 to vector<16x128xf32>
    %16 = arith.maximumf %14, %15 : vector<16x128xf32>
    %17 = arith.truncf %16 : vector<16x128xf32> to vector<16x128xbf16>
    %c0_12 = arith.constant 0 : index
    %c0_13 = arith.constant 0 : index
    %18 = vector.load %arg6[%c0_12, %c0_13] : memref<128x128xbf16, #tpu.memory_space<vmem>>, vector<128x128xbf16>
    %cst_14 = arith.constant dense<0.000000e+00> : vector<16x128xf32>
    %19 = tpu.matmul %17, %18, %cst_14 {dimension_numbers = #tpu.dot_dimension_numbers<[1], [0], [0], [1], [0, 0, 1, 1], [], []>} : vector<16x128xbf16>, vector<128x128xbf16>, vector<16x128xf32> -> vector<16x128xf32>
    %c0_15 = arith.constant 0 : index
    %c0_16 = arith.constant 0 : index
    %20 = vector.load %arg7[%c0_15, %c0_16] : memref<1x128xf32, #tpu.memory_space<vmem>>, vector<1x128xf32>
    %21 = vector.broadcast %20 : vector<1x128xf32> to vector<16x128xf32>
    %22 = arith.addf %19, %21 : vector<16x128xf32>
    %23 = arith.truncf %22 : vector<16x128xf32> to vector<16x128xbf16>
    %c0_17 = arith.constant 0 : index
    %c0_18 = arith.constant 0 : index
    %24 = vector.load %arg8[%c0_17, %c0_18] : memref<16x128xbf16, #tpu.memory_space<vmem>>, vector<16x128xbf16>
    tpu.vector_store %arg8[%c0_17, %c0_18], %23 {strides = array<i32>} : memref<16x128xbf16, #tpu.memory_space<vmem>>, vector<16x128xbf16>,
    %25 = vector.extract_strided_slice %22 {offsets = [0, 8], sizes = [16, 1], strides = [1, 1]} : vector<16x128xf32> to vector<16x1xf32>
    %26 = vector.broadcast %25 : vector<16x1xf32> to vector<16x128xf32>
    %27 = arith.subf %22, %26 : vector<16x128xf32>
    %c16_i32 = arith.constant 16 : i32
    %28 = arith.muli %arg0, %c16_i32 : i32
    %29 = tpu.iota {dimensions = array<i32: 0>} : vector<16x1xi32>
    %30 = vector.broadcast %28 : i32 to vector<16x1xi32>
    %31 = arith.addi %30, %29 : vector<16x1xi32>
    %c2_i32 = arith.constant 2 : i32
    %32 = vector.broadcast %c2_i32 : i32 to vector<16x1xi32>
    %33 = arith.cmpi slt, %31, %32 : vector<16x1xi32>
    %cst_19 = arith.constant 0.000000e+00 : f32
    %34 = vector.shape_cast %33 : vector<16x1xi1> to vector<16x1xi1>
    %35 = vector.broadcast %34 : vector<16x1xi1> to vector<16x128xi1>
    %36 = vector.broadcast %cst_19 : f32 to vector<16x128xf32>
    %37 = arith.select %35, %27, %36 : vector<16x128xi1>, vector<16x128xf32>
    %cst_20 = arith.constant dense<0.000000e+00> : vector<128xf32>
    %38 = vector.multi_reduction <add>, %37, %cst_20 [0] : vector<16x128xf32> to vector<128xf32>
    %39 = vector.shape_cast %38 : vector<128xf32> to vector<1x128xf32>
    %40 = vector.shape_cast %39 : vector<1x128xf32> to vector<1x1x128xf32>
    %41 = vector.shape_cast %40 : vector<1x1x128xf32> to vector<1x1x128xf32>
    %42 = vector.broadcast %41 : vector<1x1x128xf32> to vector<1x8x128xf32>
    %c0_21 = arith.constant 0 : index
    %c0_22 = arith.constant 0 : index
    %c0_23 = arith.constant 0 : index
    %43 = vector.load %arg9[%c0_21, %c0_22, %c0_23] : memref<1x8x128xf32, #tpu.memory_space<vmem>>, vector<1x8x128xf32>
    tpu.vector_store %arg9[%c0_21, %c0_22, %c0_23], %42 {strides = array<i32>} : memref<1x8x128xf32, #tpu.memory_space<vmem>>, vector<1x8x128xf32>,
    return
  }
  func.func @transform_0(%arg0: i32) -> (i32, i32) {
    %c0_i32 = arith.constant 0 : i32
    %c0_i32_0 = arith.constant 0 : i32
    return %arg0, %c0_i32 : i32, i32
  }
  func.func @transform_1(%arg0: i32) -> (i32, i32) {
    %c0_i32 = arith.constant 0 : i32
    %c0_i32_0 = arith.constant 0 : i32
    %c0_i32_1 = arith.constant 0 : i32
    return %c0_i32, %c0_i32_0 : i32, i32
  }
  func.func @transform_2(%arg0: i32) -> (i32, i32) {
    %c0_i32 = arith.constant 0 : i32
    %c0_i32_0 = arith.constant 0 : i32
    %c0_i32_1 = arith.constant 0 : i32
    return %c0_i32, %c0_i32_0 : i32, i32
  }
  func.func @transform_3(%arg0: i32) -> (i32, i32) {
    %c0_i32 = arith.constant 0 : i32
    %c0_i32_0 = arith.constant 0 : i32
    %c0_i32_1 = arith.constant 0 : i32
    return %c0_i32, %c0_i32_0 : i32, i32
  }
  func.func @transform_4(%arg0: i32) -> (i32, i32) {
    %c0_i32 = arith.constant 0 : i32
    %c0_i32_0 = arith.constant 0 : i32
    %c0_i32_1 = arith.constant 0 : i32
    return %c0_i32, %c0_i32_0 : i32, i32
  }
  func.func @transform_5(%arg0: i32) -> (i32, i32) {
    %c0_i32 = arith.constant 0 : i32
    %c0_i32_0 = arith.constant 0 : i32
    %c0_i32_1 = arith.constant 0 : i32
    return %c0_i32, %c0_i32_0 : i32, i32
  }
  func.func @transform_6(%arg0: i32) -> (i32, i32) {
    %c0_i32 = arith.constant 0 : i32
    %c0_i32_0 = arith.constant 0 : i32
    %c0_i32_1 = arith.constant 0 : i32
    return %c0_i32, %c0_i32_0 : i32, i32
  }
  func.func @transform_7(%arg0: i32) -> (i32, i32) {
    %c0_i32 = arith.constant 0 : i32
    %c0_i32_0 = arith.constant 0 : i32
    return %arg0, %c0_i32 : i32, i32
  }
  func.func @transform_8(%arg0: i32) -> (i32, i32, i32) {
    %c0_i32 = arith.constant 0 : i32
    %c0_i32_0 = arith.constant 0 : i32
    %c0_i32_1 = arith.constant 0 : i32
    return %arg0, %c0_i32, %c0_i32_0 : i32, i32, i32
  }
}

</mosaic_0001>

<bundles_post_ra>
// kernel: dueling_dqn_forward.1
= control target key start
LH: loop header
LB: loop body
LE: loop exit
PB: predicated region body
PF: predicated region fallthrough
CT: control target
= control target key end

     0   :  { %v574_v1 = vmov 0   ;;  %vm56_vm0 = vcmask 130048   ;;  %v575_v22 = vmov 0.0   ;;  %v36_v28 = vlaneseq  ;;  %s727_s1 = inlined_call_operand.vmem [shape: bf16[16,256], index: 1, kind: input, shape index: {}]   ;;  %s728_s0 = inlined_call_operand.vmem [shape: f32[16,16], index: 0, kind: input, shape index: {}]   ;;  %s729_s3 = inlined_call_operand.vmem [shape: bf16[256,128], index: 3, kind: input, shape index: {}]   ;;  %s730_s5 = inlined_call_operand.vmem [shape: bf16[128,128], index: 5, kind: input, shape index: {}]   ;;  %s731_s2 = inlined_call_operand.vmem [shape: f32[1,256], index: 2, kind: input, shape index: {}]   ;;  %s732_s4 = inlined_call_operand.vmem [shape: f32[1,128], index: 4, kind: input, shape index: {}]   ;;  %s733_s6 = inlined_call_operand.vmem [shape: f32[1,128], index: 6, kind: input, shape index: {}]   ;;  %s734_s7 = inlined_call_operand.vmem [shape: bf16[16,128], index: 7, kind: output, shape index: {0}]   ;;  %s735_s8 = inlined_call_operand.vmem [shape: f32[1,8,128], index: 8, kind: output, shape index: {1}]  }
   0x1   :  { %v547_v0 = vld [vmem:[%s727_s1 + $0x4] ss:$8 sps:$4 sm:$0xff]   ;;  %92 = vmatprep.mubr.bf16.mxu0 %v574_v1  ;;  %v549_v2 = vld [vmem:[%s727_s1] ss:$8 sps:$4 sm:$0xff]   ;;  %v554_v10 = vld [vmem:[%s729_s3 + $0x50] sm:$0xff]   ;;  %vm576_vm1 = vmmov 0  }
   0x2   :  { %v29_v3 = vld [vmem:[%s728_s0] sm:$0xff]  ;;  %v30_v4 = vld [vmem:[%s728_s0 + $0x8] sm:$0xff]  ;;  %60 = vmatprep.subr.bf16.mxu0 %v547_v0  ;;  %v555_v11 = vld [vmem:[%s729_s3 + $0x10] sm:$0xff]   ;;  %v698_v29 = vshrl.u32 %v36_v28, 7  ;;  %v577_v0 = vmov 8  }
   0x3   :  { %v31_v5 = vpack.c.bf16 %v30_v4, %v29_v3  ;;  %v550_v6 = vld [vmem:[%s729_s3 + $0x40] sm:$0xff]   ;;  %61 = vmatpush1.bf16.msra.mxu0 %v549_v2  ;;  %v552_v8 = vld [vmem:[%s729_s3 + $0x48] sm:$0xff]   ;;  %v556_v12 = vld [vmem:[%s729_s3 + $0x58] sm:$0xff]   ;;  %546 = vset.pattern.permute.xlu0 %v577_v0 }
   0x4   :  { %v551_v7 = vld [vmem:[%s729_s3] sm:$0xff]   ;;  %491 = vmatprep.subr.bf16.mxu1 %v550_v6  ;;  %v553_v9 = vld [vmem:[%s729_s3 + $0x8] sm:$0xff]   ;;  %v557_v13 = vld [vmem:[%s729_s3 + $0x18] sm:$0xff]   ;;  %522 = vmatprep.subr.bf16.mxu0 %v575_v22  ;;  %v38_v30 = vsub.s32 0, %v698_v29  ;;  %v42_v32 = vsub.s32 1, %v698_v29  ;;  %vm429_vm2 = vcmp.lt.s32.totalorder %v698_v29, 2 }
   0x5   :  { %492 = vmatpush3.bf16.msra.mxu1 %v551_v7  ;;  %v558_v14 = vld [vmem:[%s729_s3 + $0x60] sm:$0xff]   ;;  %v560_v16 = vld [vmem:[%s729_s3 + $0x68] sm:$0xff]   ;;  %v562_v18 = vld [vmem:[%s729_s3 + $0x70] sm:$0xff]  }
   0x6   :  { %455 = vmatmul.mubr.msk.bf16.vlgmr.msra.gmra.mrb[0].mxu0 %vm56_vm0, %v31_v5  ;;  %493 = vmatprep.subr.bf16.mxu1 %v552_v8  ;;  %v559_v15 = vld [vmem:[%s729_s3 + $0x20] sm:$0xff]   ;;  %v561_v17 = vld [vmem:[%s729_s3 + $0x28] sm:$0xff]   ;;  %v563_v19 = vld [vmem:[%s729_s3 + $0x30] sm:$0xff]  }
   0x7   :  { %v564_v20 = vld [vmem:[%s729_s3 + $0x78] sm:$0xff]   ;;  %v566_v23 = vld [vmem:[%s730_s5] sm:$0xff]   ;;  %v567_v24 = vld [vmem:[%s730_s5 + $0x8] sm:$0xff]   ;;  %538 = vmatprep.mubr.msk.bf16.mxu0 %vm576_vm1, %v575_v22 }
   0x8   :  { %v565_v21 = vld [vmem:[%s729_s3 + $0x38] sm:$0xff]   ;;  %523 = vmatpush3.bf16.msra.mxu0 %v566_v23  ;;  %v568_v25 = vld [vmem:[%s730_s5 + $0x10] sm:$0xff]   ;;  %v570_v27 = vld [vmem:[%s730_s5 + $0x20] sm:$0xff]  }
   0x9   :  { %494 = vmatpush3.bf16.msra.mxu1 %v553_v9  ;;  %524 = vmatprep.subr.bf16.mxu0 %v575_v22  ;;  %v569_v26 = vld [vmem:[%s730_s5 + $0x18] sm:$0xff]   ;;  %v34_v31 = vld [vmem:[%s731_s2] sm:$0x3]  ;;  %v571_v49 = vld [vmem:[%s730_s5 + $0x28] sm:$0xff]  }
   0xa   :  { %495 = vmatprep.subr.bf16.mxu1 %v554_v10  ;;  %v39_v33 = vrot.slane %v34_v31, %v38_v30  ;;  %v43_v34 = vrot.slane %v34_v31, %v42_v32  ;;  %v572_v50 = vld [vmem:[%s730_s5 + $0x30] sm:$0xff]   ;;  %v573_v51 = vld [vmem:[%s730_s5 + $0x38] sm:$0xff]   ;;  %v456_v53 = vld [vmem:[%s732_s4] ss:$0 sm:$0xff] }
   0xb   :  { %v473_v1 = vld [vmem:[%s733_s6] ss:$0 sm:$0xff] }
   0xc   :  { %525 = vmatpush3.bf16.msra.mxu0 %v567_v24 }
   0xd   :  { %496 = vmatpush3.bf16.msra.mxu1 %v555_v11  ;;  %526 = vmatprep.subr.bf16.mxu0 %v575_v22 }
   0xe   :  { %497 = vmatprep.subr.bf16.mxu1 %v556_v12 }
  0x10   :  { %527 = vmatpush3.bf16.msra.mxu0 %v568_v25 }
  0x11   :  { %498 = vmatpush3.bf16.msra.mxu1 %v557_v13  ;;  %528 = vmatprep.subr.bf16.mxu0 %v575_v22 }
  0x12   :  { %499 = vmatprep.subr.bf16.mxu1 %v558_v14 }
  0x14   :  { %529 = vmatpush3.bf16.msra.mxu0 %v569_v26 }
  0x15   :  { %500 = vmatpush3.bf16.msra.mxu1 %v559_v15  ;;  %530 = vmatprep.subr.bf16.mxu0 %v575_v22 }
  0x16   :  { %501 = vmatprep.subr.bf16.mxu1 %v560_v16 }
  0x18   :  { %531 = vmatpush3.bf16.msra.mxu0 %v570_v27 }
  0x19   :  { %502 = vmatpush3.bf16.msra.mxu1 %v561_v17  ;;  %532 = vmatprep.subr.bf16.mxu0 %v575_v22 }
  0x1a   :  { %503 = vmatprep.subr.bf16.mxu1 %v562_v18 }
  0x1c   :  { %533 = vmatpush3.bf16.msra.mxu0 %v571_v49 }
  0x1d   :  { %504 = vmatpush3.bf16.msra.mxu1 %v563_v19  ;;  %534 = vmatprep.subr.bf16.mxu0 %v575_v22 }
  0x1e   :  { %505 = vmatprep.subr.bf16.mxu1 %v564_v20 }
  0x20   :  { %535 = vmatpush3.bf16.msra.mxu0 %v572_v50 }
  0x21   :  { %506 = vmatpush3.bf16.msra.mxu1 %v565_v21  ;;  %536 = vmatprep.subr.bf16.mxu0 %v575_v22 }
  0x24   :  { %537 = vmatpush3.bf16.msra.mxu0 %v573_v51 }
  0xd9   :  { %v94_v35 = vpop.f32.mrb[0].mxu0 }
  0xda   :  { %v95_v36 = vadd.f32 %v94_v35, %v39_v33  ;;  %v96_v37 = vpop.f32.mrb[1].mxu0 }
  0xdb   :  { %v97_v38 = vadd.f32 %v96_v37, %v43_v34  ;;  %v98_v39 = vpop.f32.mrb[2].mxu0 }
  0xdc   :  { %v99_v40 = vadd.f32 %v98_v39, %v39_v33  ;;  %v100_v41 = vpop.f32.mrb[3].mxu0  ;;  %v103_v43 = vmax.f32 %v95_v36, 0.0 }
  0xdd   :  { %v101_v42 = vadd.f32 %v100_v41, %v43_v34  ;;  %v104_v45 = vmax.f32 %v97_v38, 0.0 }
  0xde   :  { %v105_v44 = vmax.f32 %v99_v40, 0.0 }
  0xdf   :  { %v106_v46 = vmax.f32 %v101_v42, 0.0 }
  0xe0   :  { %v107_v47 = vpack.c.bf16 %v105_v44, %v103_v43 }
  0xe1   :  { %v108_v48 = vpack.c.bf16 %v106_v46, %v104_v45 }
  0xe3   :  { %276 = vmatprep.mubr.bf16.mxu1 %v108_v48 }
  0xe4   :  { %277 = vmatmul.mubr.bf16.vlgmr.msra.gmra.mrb[0].mxu1 %v107_v47 }
 0x1b7   :  { %v507_v52 = vpop.f32.mrb[0].mxu1 }
 0x1b8   :  { %v508_v54 = vpop.f32.mrb[1].mxu1 }
 0x1b9   :  { %v509_v55 = vadd.f32 %v508_v54, %v507_v52  ;;  %v510_v56 = vpop.f32.mrb[2].mxu1 }
 0x1ba   :  { %v511_v57 = vpop.f32.mrb[3].mxu1 }
 0x1bb   :  { %v279_v58 = vadd.f32 %v509_v55, %v456_v53  ;;  %v512_v59 = vadd.f32 %v511_v57, %v510_v56 }
 0x1bd   :  { %v282_v60 = vadd.f32 %v512_v59, %v456_v53  ;;  %v285_v61 = vmax.f32 %v279_v58, 0.0 }
 0x1bf   :  { %v286_v62 = vmax.f32 %v282_v60, 0.0 }
 0x1c1   :  { %v287_v63 = vpack.c.bf16 %v286_v62, %v285_v61 }
 0x1c3   :  { %539 = vmatmul.mubr.bf16.vlgmr.msra.gmra.mrb[4].mxu0 %v287_v63 }
 0x296   :  { %v393_v2 = vpop.f32.mrb[4].mxu0 }
 0x297   :  { %v394_v3 = vadd.f32 %v473_v1, %v393_v2  ;;  %v540_v4 = vpop.f32.mrb[5].mxu0 }
 0x298   :  { %v396_v5 = vpop.f32.mrb[6].mxu0 }
 0x299   :  { %v397_v6 = vadd.f32 %v473_v1, %v396_v5  ;;  %412 = vperm.xlu0 %546, %v394_v3   ;;  %v541_v7 = vpop.f32.mrb[7].mxu0 }
 0x29b   :  { %v489_v8 = vpack.c.bf16 %v397_v6, %v394_v3 }
 0x29d   :  { %490 = vst [vmem:[%s734_s7] sm:$0xff] %v489_v8  }
 0x318   :  { %v413_v9 = vpop.permute.xlu0 %412 }
 0x319   :  { %v420_v10 = vsub.f32 %v394_v3, %v413_v9 }
 0x31b   :  { %v435_v11 = vsel %vm429_vm2, %v420_v10, 0.0 }
 0x31c   :  { %v438_v12 = vrot.slane %v435_v11, 4 }
 0x31e   :  { %v439_v13 = vadd.f32 %v438_v12, %v435_v11 }
 0x320   :  { %v440_v14 = vrot.slane %v439_v13, 2 }
 0x322   :  { %v441_v15 = vadd.f32 %v440_v14, %v439_v13 }
 0x324   :  { %v442_v16 = vrot.slane %v441_v15, 1 }
 0x326   :  { %v443_v17 = vadd.f32 %v442_v16, %v441_v15 }
 0x328   :  { %444 = vst [vmem:[%s735_s8] sm:$0xff] %v443_v17 }

</bundles_post_ra>
